<compile_context>
chip_gen: v7x
topology: tpu7x:2x2x1
jax: 0.10.0
libtpu: 0.0.40
codegen_flags: <defaults>
</compile_context>

<pallas_src>
import functools
import math

import jax
import jax.numpy as jnp
from jax import lax
from jax.experimental import pallas as pl
from jax.experimental.pallas import tpu as pltpu


# Large finite negative (instead of -inf) so fully-masked rows can never produce NaNs.
DEFAULT_MASK_VALUE = -0.7 * float(jnp.finfo(jnp.float32).max)


def _round_up(x, m):
    return (x + m - 1) // m * m


def _vmem_limit_bytes():
    """Per-generation scoped-VMEM budget: ~75% of physical, capped at 100 MiB."""
    try:
        cap = int(pltpu.get_tpu_info().vmem_capacity_bytes)
    except Exception:
        cap = 64 * 1024 * 1024  # conservative fallback (safe on v7x's 64 MiB)
    return min(cap * 3 // 4, 100 * 1024 * 1024)


# ---------------------------------------------------------------------------
# Tiled linear kernel:  out[rows, N] = x[rows, K] @ w[K, N] + b[1, N]
# grid = (N // tn, rows_pad // tm); rows axis innermost so the (K, tn) weight block index
# is constant across consecutive steps (DMA elided) and can be single-buffered.
# ---------------------------------------------------------------------------
def _linear_kernel(x_ref, w_ref, b_ref, o_ref):
    o_ref[...] = (
        jnp.dot(x_ref[...], w_ref[...], preferred_element_type=jnp.float32)
        + b_ref[...]
    ).astype(o_ref.dtype)


def _pick_col_tile(n):
    for t in (1024, 512, 256, 128):
        if n % t == 0:
            return t
    return n  # full extent (legal: equals the array dim)


def _linear(x2d, w, b2d, *, vmem_limit):
    rows, k_dim = x2d.shape
    k2, n_dim = w.shape
    assert k_dim == k2

    tm = min(512, _round_up(rows, 8))
    rows_pad = _round_up(rows, tm)
    if rows_pad != rows:
        x2d = jnp.pad(x2d, ((0, rows_pad - rows), (0, 0)))
    tn = _pick_col_tile(n_dim)

    out = pl.pallas_call(
        _linear_kernel,
        out_shape=jax.ShapeDtypeStruct((rows_pad, n_dim), x2d.dtype),
        grid_spec=pltpu.PrefetchScalarGridSpec(
            num_scalar_prefetch=0,
            grid=(n_dim // tn, rows_pad // tm),
            in_specs=[
                pl.BlockSpec((tm, k_dim), lambda j, i: (i, 0)),
                pl.BlockSpec((k_dim, tn), lambda j, i: (0, j),
                             pipeline_mode=pl.Buffered(1)),
                pl.BlockSpec((1, tn), lambda j, i: (0, j),
                             pipeline_mode=pl.Buffered(1)),
            ],
            out_specs=pl.BlockSpec((tm, tn), lambda j, i: (i, j)),
        ),
        compiler_params=pltpu.CompilerParams(
            dimension_semantics=("parallel", "parallel"),
            vmem_limit_bytes=vmem_limit,
        ),
    )(x2d, w, b2d)
    return out[:rows] if rows_pad != rows else out


# ---------------------------------------------------------------------------
# Flash attention kernel.
# grid = (B, H // hb, num_q_tiles, num_kv_tiles); kv (reduction) axis last.
# Scratch (per core): running max m, running sum l, f32 output accumulator.
# ---------------------------------------------------------------------------
def _flash_kernel(q_ref, k_ref, v_ref, o_ref, m_ref, l_ref, acc_ref, *,
                  block_q, block_kv):
    q_i = pl.program_id(2)
    kv_i = pl.program_id(3)
    q_start = q_i * block_q
    k_start = kv_i * block_kv

    @pl.when(kv_i == 0)
    def _init():
        m_ref[...] = jnp.full(m_ref.shape, -jnp.inf, dtype=m_ref.dtype)
        l_ref[...] = jnp.zeros(l_ref.shape, dtype=l_ref.dtype)
        acc_ref[...] = jnp.zeros(acc_ref.shape, dtype=acc_ref.dtype)

    def _update(apply_mask):
        q = q_ref[0]                                       # (hb, bq, hs), scale pre-folded
        k = k_ref[0]                                       # (hb, bk, hs)
        v = v_ref[0]                                       # (hb, bk, hs)
        # Contract head dims directly -> no materialized k transpose; f32 accumulation.
        s = jnp.einsum("hqd,hkd->hqk", q, k, preferred_element_type=jnp.float32)
        if apply_mask:
            hb, bq, bk = s.shape
            rows = q_start + lax.broadcasted_iota(jnp.int32, (hb, bq, bk), 1)
            cols = k_start + lax.broadcasted_iota(jnp.int32, (hb, bq, bk), 2)
            s = jnp.where(rows >= cols, s, DEFAULT_MASK_VALUE)
        m_prev = m_ref[...]
        m_new = jnp.maximum(m_prev, jnp.max(s, axis=-1, keepdims=True))
        alpha = jnp.exp(m_prev - m_new)
        p = jnp.exp(s - m_new)
        l_ref[...] = alpha * l_ref[...] + jnp.sum(p, axis=-1, keepdims=True)
        acc_ref[...] = alpha * acc_ref[...] + jnp.einsum(
            "hqk,hkd->hqd", p.astype(v.dtype), v, preferred_element_type=jnp.float32
        )
        m_ref[...] = m_new

    # Tile classification relative to the causal diagonal (element-based so block_q may
    # differ from block_kv): fully-below -> no mask, straddling -> masked, above -> skip.
    is_full = (k_start + block_kv - 1) <= q_start
    is_partial = jnp.logical_and(k_start <= q_start + block_q - 1,
                                 jnp.logical_not(is_full))

    @pl.when(is_full)
    def _full_block():
        _update(apply_mask=False)

    @pl.when(is_partial)
    def _masked_block():
        _update(apply_mask=True)

    # Finalize on the last contributing kv tile for this q tile (exact divide: it runs
    # once per q tile, so the exact path costs essentially nothing).
    last_kv = (q_start + block_q - 1) // block_kv
    @pl.when(kv_i == last_kv)
    def _finalize():
        o_ref[0] = (acc_ref[...] / l_ref[...]).astype(o_ref.dtype)


def _flash_attention(q, k, v, *, block_q, block_kv, heads_per_block, vmem_limit):
    B, H, T_pad, hs = q.shape
    hb = heads_per_block
    nq = T_pad // block_q
    nk = T_pad // block_kv

    def q_map(b, h, qi, ki):
        return (b, h, qi, 0)

    def kv_map(b, h, qi, ki):
        # Clamp to the last contributing kv tile: upper-triangle grid steps re-use the
        # previous block index, so Pallas elides their K/V DMAs (no wasted HBM traffic).
        last = (qi * block_q + block_q - 1) // block_kv
        return (b, h, jnp.minimum(ki, last), 0)

    kernel = functools.partial(_flash_kernel, block_q=block_q, block_kv=block_kv)
    return pl.pallas_call(
        kernel,
        out_shape=jax.ShapeDtypeStruct((B, H, T_pad, hs), q.dtype),
        grid_spec=pltpu.PrefetchScalarGridSpec(
            num_scalar_prefetch=0,
            grid=(B, H // hb, nq, nk),
            in_specs=[
                pl.BlockSpec((1, hb, block_q, hs), q_map),
                pl.BlockSpec((1, hb, block_kv, hs), kv_map),
                pl.BlockSpec((1, hb, block_kv, hs), kv_map),
            ],
            out_specs=pl.BlockSpec((1, hb, block_q, hs), q_map),
            scratch_shapes=[
                pltpu.VMEM((hb, block_q, 1), jnp.float32),   # running max
                pltpu.VMEM((hb, block_q, 1), jnp.float32),   # running sum
                pltpu.VMEM((hb, block_q, hs), jnp.float32),  # output accumulator
            ],
        ),
        compiler_params=pltpu.CompilerParams(
            dimension_semantics=("parallel", "parallel", "parallel", "arbitrary"),
            vmem_limit_bytes=vmem_limit,
        ),
    )(q, k, v)


def _attn_block_sizes(T):
    if T >= 1024:
        return 512, 256        # block_q, block_kv (block_q multiple of block_kv)
    if T >= 256:
        return 256, 256
    b = _round_up(T, 8)
    return b, b


def _heads_per_block(n_head, head_size):
    target = min(n_head, max(1, 128 // max(head_size, 1)))
    for cand in range(target, 0, -1):
        if n_head % cand == 0:
            return cand
    return 1


# ---------------------------------------------------------------------------
# Public wrapper: matches CasualSelfAttention.forward(x) semantics.
# Weights follow nn.Linear convention: w_attn (3C, C), b_attn (3C,), w_proj (C, C), b_proj (C,).
# ---------------------------------------------------------------------------
def causal_self_attention(x, w_attn, b_attn, w_proj, b_proj, *, n_head,
                          compute_dtype=None):
    B, T, C = x.shape
    assert C % n_head == 0, "Embedding dimension must be divisible by number of heads"
    hs = C // n_head
    vmem_limit = _vmem_limit_bytes()

    if compute_dtype is not None:
        x = x.astype(compute_dtype)
        w_attn = w_attn.astype(compute_dtype)
        w_proj = w_proj.astype(compute_dtype)
    # Biases stay f32: they are added to the f32 accumulator inside the kernel.
    b_attn = b_attn.astype(jnp.float32)
    b_proj = b_proj.astype(jnp.float32)

    # Fold 1/sqrt(hs) into the q rows of the qkv projection (free at runtime).
    scale = 1.0 / math.sqrt(hs)
    scale_vec = jnp.concatenate(
        [jnp.full((C,), scale, jnp.float32), jnp.ones((2 * C,), jnp.float32)]
    )
    w_attn_t = (w_attn.astype(jnp.float32) * scale_vec[:, None]).T.astype(w_attn.dtype)
    b_attn_s = (b_attn * scale_vec).reshape(1, 3 * C)
    w_proj_t = w_proj.T
    b_proj_2 = b_proj.reshape(1, C)

    # 1) qkv projection.
    qkv = _linear(x.reshape(B * T, C), w_attn_t, b_attn_s, vmem_limit=vmem_limit)

    # Head-major layout (wrapper glue).
    qkv = qkv.reshape(B, T, 3, n_head, hs).transpose(2, 0, 3, 1, 4)  # (3, B, H, T, hs)
    q, k, v = qkv[0], qkv[1], qkv[2]

    # 2) flash attention with causal DMA elision; pad T to the block size.
    block_q, block_kv = _attn_block_sizes(T)
    T_pad = _round_up(T, block_q)
    if T_pad != T:
        pad = ((0, 0), (0, 0), (0, T_pad - T), (0, 0))
        q = jnp.pad(q, pad)
        k = jnp.pad(k, pad)
        v = jnp.pad(v, pad)

    hb = _heads_per_block(n_head, hs)
    y = _flash_attention(q, k, v, block_q=block_q, block_kv=block_kv,
                         heads_per_block=hb, vmem_limit=vmem_limit)
    y = y[:, :, :T, :]

    # 3) output projection.
    y = y.transpose(0, 2, 1, 3).reshape(B * T, C)
    out = _linear(y, w_proj_t, b_proj_2, vmem_limit=vmem_limit)
    return out.reshape(B, T, C)


# ---------------------------------------------------------------------------
# Pure-JAX reference mirroring the PyTorch forward.
# ---------------------------------------------------------------------------
def _reference(x, w_attn, b_attn, w_proj, b_proj, n_head):
    B, T, C = x.shape
    hs = C // n_head
    qkv = x @ w_attn.T + b_attn
    q, k, v = jnp.split(qkv, 3, axis=-1)
    q = q.reshape(B, T, n_head, hs).transpose(0, 2, 1, 3)
    k = k.reshape(B, T, n_head, hs).transpose(0, 2, 1, 3)
    v = v.reshape(B, T, n_head, hs).transpose(0, 2, 1, 3)
    s = jnp.einsum("bhqd,bhkd->bhqk", q, k) / jnp.sqrt(jnp.float32(hs))
    mask = jnp.tril(jnp.ones((T, T), dtype=bool))
    s = jnp.where(mask, s, -jnp.inf)
    p = jax.nn.softmax(s, axis=-1)
    y = jnp.einsum("bhqk,bhkd->bhqd", p, v)
    y = y.transpose(0, 2, 1, 3).reshape(B, T, C)
    return y @ w_proj.T + b_proj


if __name__ == "__main__":
    B, T, n_embed, n_head = 2, 8, 32, 4

    key = jax.random.PRNGKey(0)
    kx, kw1, kb1, kw2, kb2 = jax.random.split(key, 5)

    x = jax.random.normal(kx, (B, T, n_embed), dtype=jnp.float32)
    w_attn = jax.random.normal(kw1, (3 * n_embed, n_embed), dtype=jnp.float32) * 0.02
    b_attn = jax.random.normal(kb1, (3 * n_embed,), dtype=jnp.float32) * 0.02
    w_proj = jax.random.normal(kw2, (n_embed, n_embed), dtype=jnp.float32) * 0.02
    b_proj = jax.random.normal(kb2, (n_embed,), dtype=jnp.float32) * 0.02

    ref = _reference(x, w_attn, b_attn, w_proj, b_proj, n_head)

    # f32 path: tight tolerance (exact softmax division, only accumulation-order drift).
    out = causal_self_attention(x, w_attn, b_attn, w_proj, b_proj, n_head=n_head)
    out = jax.block_until_ready(out)
    assert out.shape == (B, T, n_embed)
    assert jnp.allclose(out, ref, atol=1e-3, rtol=1e-3), "f32 mismatch vs. reference"

    # bf16 path: MXU-native dtype on all generations; looser tolerance for bf16 rounding.
    out_bf16 = causal_self_attention(
        x, w_attn, b_attn, w_proj, b_proj, n_head=n_head, compute_dtype=jnp.bfloat16
    )
    out_bf16 = jax.block_until_ready(out_bf16).astype(jnp.float32)
    assert jnp.allclose(out_bf16, ref, atol=3e-2, rtol=3e-2), "bf16 mismatch vs. reference"

    print("KERNEL_OK")
</pallas_src>

<mosaic_0001>
module attributes {stable_mosaic.version = 11 : i64} {
  func.func @_linear_kernel(%arg0: i32, %arg1: i32, %arg2: memref<16x32xf32, #tpu.memory_space<vmem>>, %arg3: memref<32x96xf32, #tpu.memory_space<vmem>>, %arg4: memref<1x96xf32, #tpu.memory_space<vmem>>, %arg5: memref<16x96xf32, #tpu.memory_space<vmem>>) attributes {dimension_semantics = [#tpu.dimension_semantics<parallel>, #tpu.dimension_semantics<parallel>], iteration_bounds = array<i64: 1, 1>, scalar_prefetch = 0 : i64, scratch_operands = 0 : i64, tpu.core_type = #tpu.core_type<tc>, window_params = [{transform_indices = @transform_0, window_bounds = array<i64: 16, 32>}, {pipeline_mode = #tpu.pipeline_mode<synchronous>, transform_indices = @transform_1, window_bounds = array<i64: 32, 96>}, {pipeline_mode = #tpu.pipeline_mode<synchronous>, transform_indices = @transform_2, window_bounds = array<i64: 1, 96>}, {transform_indices = @transform_3, window_bounds = array<i64: 16, 96>}]} {
    %c0 = arith.constant 0 : index
    %c0_0 = arith.constant 0 : index
    %0 = vector.load %arg2[%c0, %c0_0] : memref<16x32xf32, #tpu.memory_space<vmem>>, vector<16x32xf32>
    %c0_1 = arith.constant 0 : index
    %c0_2 = arith.constant 0 : index
    %1 = vector.load %arg3[%c0_1, %c0_2] : memref<32x96xf32, #tpu.memory_space<vmem>>, vector<32x96xf32>
    %cst = arith.constant dense<0.000000e+00> : vector<16x96xf32>
    %2 = tpu.matmul %0, %1, %cst {dimension_numbers = #tpu.dot_dimension_numbers<[1], [0], [0], [1], [0, 0, 1, 1], [], []>} : vector<16x32xf32>, vector<32x96xf32>, vector<16x96xf32> -> vector<16x96xf32>
    %c0_3 = arith.constant 0 : index
    %c0_4 = arith.constant 0 : index
    %3 = vector.load %arg4[%c0_3, %c0_4] : memref<1x96xf32, #tpu.memory_space<vmem>>, vector<1x96xf32>
    %4 = vector.broadcast %3 : vector<1x96xf32> to vector<16x96xf32>
    %5 = arith.addf %2, %4 : vector<16x96xf32>
    %c0_5 = arith.constant 0 : index
    %c0_6 = arith.constant 0 : index
    %6 = vector.load %arg5[%c0_5, %c0_6] : memref<16x96xf32, #tpu.memory_space<vmem>>, vector<16x96xf32>
    tpu.vector_store %arg5[%c0_5, %c0_6], %5 {strides = array<i32>} : memref<16x96xf32, #tpu.memory_space<vmem>>, vector<16x96xf32>,
    return
  }
  func.func @transform_0(%arg0: i32, %arg1: i32) -> (i32, i32) {
    %c0_i32 = arith.constant 0 : i32
    %c0_i32_0 = arith.constant 0 : i32
    return %arg1, %c0_i32 : i32, i32
  }
  func.func @transform_1(%arg0: i32, %arg1: i32) -> (i32, i32) {
    %c0_i32 = arith.constant 0 : i32
    %c0_i32_0 = arith.constant 0 : i32
    return %c0_i32, %arg0 : i32, i32
  }
  func.func @transform_2(%arg0: i32, %arg1: i32) -> (i32, i32) {
    %c0_i32 = arith.constant 0 : i32
    %c0_i32_0 = arith.constant 0 : i32
    return %c0_i32, %arg0 : i32, i32
  }
  func.func @transform_3(%arg0: i32, %arg1: i32) -> (i32, i32) {
    %c0_i32 = arith.constant 0 : i32
    return %arg1, %arg0 : i32, i32
  }
}

</mosaic_0001>

<bundles_post_ra>
// kernel: tpu_custom_call.1
= control target key start
LH: loop header
LB: loop body
LE: loop exit
PB: predicated region body
PF: predicated region fallthrough
CT: control target
= control target key end

     0   :  { %8 = vsyncpa [#allocation3], 0  ;;  %s337_s0 = inlined_call_operand.hbm [shape: f32[16,32], index: 0, kind: input, shape index: {}]   ;;  %s338_s1 = inlined_call_operand.hbm [shape: f32[32,96], index: 1, kind: input, shape index: {}]   ;;  %s339_s2 = inlined_call_operand.vmem [shape: f32[1,96], index: 2, kind: input, shape index: {}]   ;;  %s340_s3 = inlined_call_operand.hbm [shape: f32[16,96], index: 3, kind: output, shape index: {}]  }
   0x1   :  { %9 = vsyncpa [#allocation6], 0 }
   0x2   :  { %10 = vsyncpa [#allocation4], 0  ;;  %s264_s12 = smov [#allocation2]   ;;  %s192_s16 = scalar_lea.hbm %s337_s0, 256 }
   0x3   :  { %s16_s13 = sshll.u32 %s264_s12, 4  ;;  %p193_p0 = scmp.ne.s32.totalorder %s337_s0, %s192_s16  ;;  %s17_s13 = int_to_ptr.vmem [resolvable:$true] %s16_s13 }
   0x4   :  { %p196_p1 = scmp.lt.u32.totalorder %s192_s16, %s337_s0 }
   0x6   :  { %p198_p2 = pnand %p196_p1, %p193_p0 }
   0x8   :  { %201 = shalt.err (!%p198_p2)
}
   0x9   :  { %s202_s21 = scalar_lea.vmem %s17_s13, 256  ;;  %p207_p4 = scmp.lt.s32.totalorder %s17_s13, %s17_s13 }
   0xa   :  { %p203_p3 = scmp.ne.s32.totalorder %s17_s13, %s202_s21  ;;  %p208_p5 = scmp.lt.s32.totalorder %s202_s21, %s202_s21 }
   0xc   :  { %p209_p6 = por %p208_p5, %p207_p4 }
   0xe   :  { %p210_p7 = pnand %p209_p6, %p203_p3 }
  0x10   :  { %213 = shalt.err (!%p210_p7)
}
  0x11   :  { %s265_s22 = smov 128   ;;  %s266_s23 = smov 8  }
  0x12   :  { %22 = dma.hbm_to_vmem [thread:$0]  %s337_s0, 256, %s17_s13, [#allocation3], %s265_s22, %s265_s22, %s266_s23  }
  0x13   :  { %s267_s26 = smov [#allocation5]   ;;  %s214_s30 = scalar_lea.hbm %s338_s1, 512 }
  0x14   :  { %s28_s27 = sshll.u32 %s267_s26, 4  ;;  %p215_p8 = scmp.ne.s32.totalorder %s338_s1, %s214_s30  ;;  %s29_s27 = int_to_ptr.vmem [resolvable:$true] %s28_s27 }
  0x15   :  { %p218_p9 = scmp.lt.u32.totalorder %s214_s30, %s338_s1 }
  0x17   :  { %p220_p10 = pnand %p218_p9, %p215_p8 }
  0x19   :  { %223 = shalt.err (!%p220_p10)
}
  0x1a   :  { %s224_s8 = scalar_lea.vmem %s29_s27, 512  ;;  %p229_p12 = scmp.lt.s32.totalorder %s29_s27, %s29_s27 }
  0x1b   :  { %p225_p11 = scmp.ne.s32.totalorder %s29_s27, %s224_s8  ;;  %p230_p13 = scmp.lt.s32.totalorder %s224_s8, %s224_s8 }
  0x1d   :  { %p231_p0 = por %p230_p13, %p229_p12 }
  0x1f   :  { %p232_p1 = pnand %p231_p0, %p225_p11 }
  0x21   :  { %235 = shalt.err (!%p232_p1)
}
  0x22   :  { %34 = dma.hbm_to_vmem [thread:$0]  %s338_s1, 512, %s29_s27, [#allocation6], %s265_s22, %s265_s22, %s266_s23  }
  0x23   :  { %258 = dma.done.wait [#allocation3], 256  }
  0x24   :  { %259 = vsyncadd [#allocation3], 4294967040 }
  0x25   :  { %260 = dma.done.wait [#allocation6], 512  }
  0x26   :  { %261 = vsyncadd [#allocation6], 4294966784  ;;  %vm56_vm0 = vcmask 261120   ;;  %v45_v0 = vld [vmem:[#allocation5] sm:$0xff]  ;;  %v46_v1 = vld [vmem:[#allocation5 + $0x8] sm:$0xff]  ;;  %s268_s11 = smov [#allocation7]  }
  0x27   :  { %v47_v2 = vld [vmem:[#allocation5 + $0x10] sm:$0xff]  ;;  %v179_v3 = vpack.c.bf16 %v46_v1, %v45_v0  ;;  %v48_v4 = vld [vmem:[#allocation5 + $0x18] sm:$0xff]  ;;  %s146_s12 = sshll.u32 %s268_s11, 4  ;;  %vm138_vm1 = vcmask 785408   ;;  %s147_s12 = int_to_ptr.vmem [resolvable:$true] %s146_s12 }
  0x28   :  { %v43_v5 = vld [vmem:[#allocation2] sm:$0xff]  ;;  %v183_v6 = vpack.c.bf16 %v48_v4, %v47_v2  ;;  %v44_v7 = vld [vmem:[#allocation2 + $0x8] sm:$0xff]  ;;  %s236_s13 = scalar_lea.vmem %s147_s12, 256  ;;  %p241_p3 = scmp.lt.s32.totalorder %s147_s12, %s147_s12 }
  0x29   :  { %176 = vmatprep.mubr.msk.f32.mxu0 %vm56_vm0, %v43_v5  ;;  %180 = vmatprep.subr.bf16.mxu0 %v179_v3  ;;  %v159_v8 = vld [vmem:[%s339_s2] ss:$0 sm:$0xff]  ;;  %p237_p2 = scmp.ne.s32.totalorder %s147_s12, %s236_s13  ;;  %p242_p4 = scmp.lt.s32.totalorder %s236_s13, %s236_s13 }
  0x2a   :  { %182 = vmatpush3.bf16.msra.mxu0 %v179_v3 }
  0x2b   :  { %184 = vmatprep.subr.bf16.mxu0 %v183_v6  ;;  %p243_p5 = por %p242_p4, %p241_p3 }
  0x2d   :  { %p244_p6 = pnand %p243_p5, %p237_p2 }
  0x2e   :  { %186 = vmatpush3.bf16.msra.mxu0 %v183_v6 }
  0x31   :  { %177 = vmatmul.mubr.msk.f32.vlgmr.msra.gmra.mrb[0].mxu0 %vm56_vm0, %v44_v7 }
 0x104   :  { %v178_v9 = vpop.f32.mrb[0].mxu0 }
 0x105   :  { %v135_v10 = vadd.f32 %v178_v9, %v159_v8  ;;  %v129_v11 = vpop.f32.mrb[1].mxu0 }
 0x106   :  { %v130_v12 = vadd.f32 %v159_v8, %v129_v11 }
 0x107   :  { %140 = vst.msk [vmem:[#allocation7 + $0x8] sm:$0xff] %vm138_vm1, %v135_v10 }
 0x108   :  { %139 = vst.msk [vmem:[#allocation7] sm:$0xff] %vm138_vm1, %v130_v12 }
 0x109   :  { %247 = shalt.err (!%p244_p6)
}
 0x10a   :  { %s248_s2 = scalar_lea.hbm %s340_s3, 256 }
 0x10b   :  { %p249_p7 = scmp.ne.s32.totalorder %s340_s3, %s248_s2  ;;  %p252_p8 = scmp.lt.u32.totalorder %s248_s2, %s340_s3 }
 0x10d   :  { %p254_p9 = pnand %p252_p8, %p249_p7 }
 0x10f   :  { %257 = shalt.err (!%p254_p9)
}
 0x110   :  { %152 = dma.vmem_to_hbm [thread:$0]  %s147_s12, 256, %s340_s3, [#allocation4], %s265_s22, %s265_s22, %s266_s23  }
 0x111   :  { %262 = dma.done.wait [#allocation4], 256  }
 0x112   :  { %263 = vsyncadd [#allocation4], 4294967040 }
 0x113   :  { %156 = vsyncpa [#allocation3], 1 }
 0x114   :  { %157 = vsyncpa [#allocation6], 1 }
 0x115   :  { %158 = vsyncpa [#allocation4], 1 }

</bundles_post_ra>
